<compile_context>
chip_gen: v6e
topology: v6e:2x2x1
jax: 0.10.0
libtpu: 0.0.40
codegen_flags: <defaults>
</compile_context>

<pallas_src>
import jax
import jax.numpy as jnp
from jax.experimental import pallas as pl
from jax.experimental.pallas import tpu as pltpu


def gated_conv_bn_kernel(s_ref, x2_ref, w2_ref, g_ref, bt_ref, o_ref):
    """Grid = (i: output-channel tiles, k: reduction tiles over channels)."""
    k = pl.program_id(1)

    # --- squeeze-excite gating of this reduction tile (bf16 on the VPU) ---
    z = s_ref[...] * x2_ref[...]                       # (tk, P) bf16

    # --- 1x1 conv tile: acc[o, p] = sum_c w2[o, c] * z[c, p]  (MXU, f32 accum) ---
    acc = jnp.dot(w2_ref[...], z, preferred_element_type=jnp.float32)

    # o_ref's index_map ignores k, so the f32 output block is resident across the
    # reduction axis and doubles as the accumulator (no VMEM scratch needed).
    @pl.when(k == 0)
    def _init():
        o_ref[...] = acc

    @pl.when(k != 0)
    def _accum():
        o_ref[...] += acc

    @pl.when(k == pl.num_programs(1) - 1)
    def _finalize():
        # BatchNorm2d, training mode: per-channel stats over (N, H, W) == lane axis.
        y = o_ref[...]                                 # (tn, P) f32
        mean = jnp.mean(y, axis=1, keepdims=True)
        d = y - mean
        var = jnp.mean(d * d, axis=1, keepdims=True)   # biased variance (PyTorch fwd)
        y_hat = d * jax.lax.rsqrt(var + 1e-5)
        o_ref[...] = y_hat * g_ref[...] + bt_ref[...]


def _round_up(x, m):
    return (x + m - 1) // m * m


def _pick_tile(dim, desired, quantum):
    """Largest t <= desired with dim % t == 0 and t % quantum == 0; else full dim."""
    if dim <= desired:
        return dim
    t = (min(desired, dim) // quantum) * quantum
    while t >= quantum:
        if dim % t == 0:
            return t
        t -= quantum
    return dim


def fused_forward(x385, x383, w1, b1, w2, gamma, beta, *, tn=368, tk=1 << 30):
    """x385: (1, C1, 1, 1), x383: (1, C2, H, W) -> (1, C2, H, W) float32."""
    N, C1 = x385.shape[:2]
    _, C2, H, W = x383.shape
    assert N == 1, "kernel flattening assumes batch == 1 (as in the module)"
    P = N * H * W

    # ---- squeeze-excite gate in plain XLA (tiny matvec; keeps W1 out of VMEM) ----
    x1 = jnp.maximum(x385.reshape(C1).astype(jnp.float32), 0.0)
    s = jax.nn.sigmoid(w1.astype(jnp.float32) @ x1 + b1.astype(jnp.float32))  # (C2,)

    # ---- pad the channel dim to a multiple of 128 so tiles are (16,128)-aligned ---
    C2p = _round_up(C2, 128)
    pad = C2p - C2

    s_col = s.astype(jnp.bfloat16).reshape(C2, 1)
    x2_mat = x383.reshape(C2, P).astype(jnp.bfloat16)
    w2_b = w2.astype(jnp.bfloat16)
    g_col = gamma.reshape(C2, 1).astype(jnp.float32)
    bt_col = beta.reshape(C2, 1).astype(jnp.float32)

    if pad:
        s_col = jnp.pad(s_col, ((0, pad), (0, 0)))
        x2_mat = jnp.pad(x2_mat, ((0, pad), (0, 0)))
        w2_b = jnp.pad(w2_b, ((0, pad), (0, pad)))     # zero rows & cols -> no effect
        g_col = jnp.pad(g_col, ((0, pad), (0, 0)))
        bt_col = jnp.pad(bt_col, ((0, pad), (0, 0)))

    # Output-channel tile: 16-aligned (bf16 w2 sublane packing), exact divisor of C2p.
    # Reduction tile: 128-aligned; default is the full padded reduction (single step).
    tn = _pick_tile(C2p, tn, 16)
    tk = _pick_tile(C2p, tk, 128)
    grid = (C2p // tn, C2p // tk)

    cost = pl.CostEstimate(
        flops=int(2 * C2p * C2p * P),
        transcendentals=0,
        bytes_accessed=int(w2_b.size * 2 + x2_mat.size * 2 + C2p * P * 4),
    )

    out = pl.pallas_call(
        gated_conv_bn_kernel,
        out_shape=jax.ShapeDtypeStruct((C2p, P), jnp.float32),
        grid_spec=pltpu.PrefetchScalarGridSpec(
            num_scalar_prefetch=0,
            grid=grid,
            in_specs=[
                pl.BlockSpec((tk, 1), lambda i, k: (k, 0)),    # s   (gate)
                pl.BlockSpec((tk, P), lambda i, k: (k, 0)),    # x2  (feature map)
                pl.BlockSpec((tn, tk), lambda i, k: (i, k)),   # w2  (dominant stream)
                pl.BlockSpec((tn, 1), lambda i, k: (i, 0)),    # gamma
                pl.BlockSpec((tn, 1), lambda i, k: (i, 0)),    # beta
            ],
            out_specs=pl.BlockSpec((tn, P), lambda i, k: (i, 0)),
        ),
        compiler_params=pltpu.CompilerParams(
            dimension_semantics=("parallel", "arbitrary")),
        cost_estimate=cost,
    )(s_col, x2_mat, w2_b, g_col, bt_col)

    return out[:C2].reshape(1, C2, H, W)


def reference_forward(x385, x383, w1, b1, w2, gamma, beta):
    """Pure-JAX reference matching the kernel's numerics (bf16 matmul inputs,
    f32 accumulation / BN) so the comparison isolates the Pallas implementation."""
    N, C1 = x385.shape[:2]
    _, C2, H, W = x383.shape
    P = N * H * W

    x1 = jnp.maximum(x385.reshape(C1).astype(jnp.float32), 0.0)
    s = jax.nn.sigmoid(w1.astype(jnp.float32) @ x1 + b1.astype(jnp.float32))  # (C2,)

    z = s.astype(jnp.bfloat16).reshape(C2, 1) * x383.reshape(C2, P).astype(jnp.bfloat16)
    y = jnp.dot(w2.astype(jnp.bfloat16), z, preferred_element_type=jnp.float32)

    mean = y.mean(axis=1, keepdims=True)
    var = ((y - mean) ** 2).mean(axis=1, keepdims=True)
    y_hat = (y - mean) * jax.lax.rsqrt(var + 1e-5)
    out = y_hat * gamma.reshape(C2, 1) + beta.reshape(C2, 1)
    return out.reshape(N, C2, H, W)


if __name__ == "__main__":
    # Small shapes consistent with the module structure
    # (real module: C1=726, C2=2904, H=W=14, N=1 — scaled down here, with C2=200
    #  deliberately NOT a multiple of 128 so the padding path and the 2-D
    #  (output-tile, reduction-tile) grid are both exercised: C2p=256, grid=(4, 2)).
    N, C1, C2, H, W = 1, 16, 200, 8, 8

    key = jax.random.PRNGKey(0)
    k1, k2, k3, k4, k5, k6, k7 = jax.random.split(key, 7)

    x385 = jax.random.normal(k1, (N, C1, 1, 1), jnp.float32)      # SE input
    x383 = jax.random.normal(k2, (N, C2, H, W), jnp.float32)      # feature map

    w1 = jax.random.normal(k3, (C2, C1), jnp.float32) * 0.1       # conv2d122 weight (1x1)
    b1 = jax.random.normal(k4, (C2,), jnp.float32) * 0.1          # conv2d122 bias
    w2 = jax.random.normal(k5, (C2, C2), jnp.float32) * 0.1       # conv2d123 weight (1x1)
    gamma = 1.0 + 0.1 * jax.random.normal(k6, (C2,), jnp.float32)  # BN weight
    beta = 0.1 * jax.random.normal(k7, (C2,), jnp.float32)         # BN bias

    out = fused_forward(x385, x383, w1, b1, w2, gamma, beta, tn=64, tk=128)
    out = jax.block_until_ready(out)

    ref = reference_forward(x385, x383, w1, b1, w2, gamma, beta)
    assert out.shape == (N, C2, H, W)
    max_err = jnp.max(jnp.abs(out - ref))
    assert jnp.allclose(out, ref, rtol=5e-3, atol=5e-3), f"max abs err {max_err}"

    print("KERNEL_OK")
</pallas_src>

<mosaic_0001>
module attributes {stable_mosaic.version = 11 : i64} {
  func.func @gated_conv_bn_kernel(%arg0: i32, %arg1: i32, %arg2: memref<128x1xbf16, #tpu.memory_space<vmem>>, %arg3: memref<128x64xbf16, #tpu.memory_space<vmem>>, %arg4: memref<64x128xbf16, #tpu.memory_space<vmem>>, %arg5: memref<64x1xf32, #tpu.memory_space<vmem>>, %arg6: memref<64x1xf32, #tpu.memory_space<vmem>>, %arg7: memref<64x64xf32, #tpu.memory_space<vmem>>) attributes {dimension_semantics = [#tpu.dimension_semantics<parallel>, #tpu.dimension_semantics<arbitrary>], iteration_bounds = array<i64: 4, 2>, scalar_prefetch = 0 : i64, scratch_operands = 0 : i64, tpu.core_type = #tpu.core_type<tc>, window_params = [{transform_indices = @transform_0, window_bounds = array<i64: 128, 1>}, {transform_indices = @transform_1, window_bounds = array<i64: 128, 64>}, {transform_indices = @transform_2, window_bounds = array<i64: 64, 128>}, {transform_indices = @transform_3, window_bounds = array<i64: 64, 1>}, {transform_indices = @transform_4, window_bounds = array<i64: 64, 1>}, {transform_indices = @transform_5, window_bounds = array<i64: 64, 64>}]} {
    %c0 = arith.constant 0 : index
    %c0_0 = arith.constant 0 : index
    %0 = vector.load %arg2[%c0, %c0_0] : memref<128x1xbf16, #tpu.memory_space<vmem>>, vector<128x1xbf16>
    %c0_1 = arith.constant 0 : index
    %c0_2 = arith.constant 0 : index
    %1 = vector.load %arg3[%c0_1, %c0_2] : memref<128x64xbf16, #tpu.memory_space<vmem>>, vector<128x64xbf16>
    %2 = vector.broadcast %0 : vector<128x1xbf16> to vector<128x64xbf16>
    %3 = arith.mulf %2, %1 : vector<128x64xbf16>
    %c0_3 = arith.constant 0 : index
    %c0_4 = arith.constant 0 : index
    %4 = vector.load %arg4[%c0_3, %c0_4] : memref<64x128xbf16, #tpu.memory_space<vmem>>, vector<64x128xbf16>
    %cst = arith.constant dense<0.000000e+00> : vector<64x64xf32>
    %5 = tpu.matmul %4, %3, %cst {dimension_numbers = #tpu.dot_dimension_numbers<[1], [0], [0], [1], [0, 0, 1, 1], [], []>} : vector<64x128xbf16>, vector<128x64xbf16>, vector<64x64xf32> -> vector<64x64xf32>
    %c0_i32 = arith.constant 0 : i32
    %6 = arith.cmpi eq, %arg1, %c0_i32 : i32
    %7 = arith.extui %6 : i1 to i32
    %c0_i32_5 = arith.constant 0 : i32
    %8 = arith.cmpi ne, %7, %c0_i32_5 : i32
    scf.if %8 {
      %c0_9 = arith.constant 0 : index
      %c0_10 = arith.constant 0 : index
      %15 = vector.load %arg7[%c0_9, %c0_10] : memref<64x64xf32, #tpu.memory_space<vmem>>, vector<64x64xf32>
      tpu.vector_store %arg7[%c0_9, %c0_10], %5 {strides = array<i32>} : memref<64x64xf32, #tpu.memory_space<vmem>>, vector<64x64xf32>,
    } else {
    }
    %c0_i32_6 = arith.constant 0 : i32
    %9 = arith.cmpi ne, %arg1, %c0_i32_6 : i32
    %10 = arith.extui %9 : i1 to i32
    %c0_i32_7 = arith.constant 0 : i32
    %11 = arith.cmpi ne, %10, %c0_i32_7 : i32
    scf.if %11 {
      %c0_9 = arith.constant 0 : index
      %c0_10 = arith.constant 0 : index
      %15 = vector.load %arg7[%c0_9, %c0_10] : memref<64x64xf32, #tpu.memory_space<vmem>>, vector<64x64xf32>
      %16 = arith.addf %15, %5 : vector<64x64xf32>
      %c0_11 = arith.constant 0 : index
      %c0_12 = arith.constant 0 : index
      %17 = vector.load %arg7[%c0_11, %c0_12] : memref<64x64xf32, #tpu.memory_space<vmem>>, vector<64x64xf32>
      tpu.vector_store %arg7[%c0_11, %c0_12], %16 {strides = array<i32>} : memref<64x64xf32, #tpu.memory_space<vmem>>, vector<64x64xf32>,
    } else {
    }
    %c1_i32 = arith.constant 1 : i32
    %12 = arith.cmpi eq, %arg1, %c1_i32 : i32
    %13 = arith.extui %12 : i1 to i32
    %c0_i32_8 = arith.constant 0 : i32
    %14 = arith.cmpi ne, %13, %c0_i32_8 : i32
    scf.if %14 {
      %c0_9 = arith.constant 0 : index
      %c0_10 = arith.constant 0 : index
      %15 = vector.load %arg7[%c0_9, %c0_10] : memref<64x64xf32, #tpu.memory_space<vmem>>, vector<64x64xf32>
      %cst_11 = arith.constant dense<0.000000e+00> : vector<64xf32>
      %16 = vector.multi_reduction <add>, %15, %cst_11 [1] : vector<64x64xf32> to vector<64xf32>
      %17 = vector.shape_cast %16 : vector<64xf32> to vector<64x1xf32>
      %cst_12 = arith.constant 6.400000e+01 : f32
      %18 = vector.broadcast %cst_12 : f32 to vector<64x1xf32>
      %19 = arith.divf %17, %18 : vector<64x1xf32>
      %20 = vector.broadcast %19 : vector<64x1xf32> to vector<64x64xf32>
      %21 = arith.subf %15, %20 : vector<64x64xf32>
      %22 = arith.mulf %21, %21 : vector<64x64xf32>
      %cst_13 = arith.constant dense<0.000000e+00> : vector<64xf32>
      %23 = vector.multi_reduction <add>, %22, %cst_13 [1] : vector<64x64xf32> to vector<64xf32>
      %24 = vector.shape_cast %23 : vector<64xf32> to vector<64x1xf32>
      %cst_14 = arith.constant 6.400000e+01 : f32
      %25 = vector.broadcast %cst_14 : f32 to vector<64x1xf32>
      %26 = arith.divf %24, %25 : vector<64x1xf32>
      %cst_15 = arith.constant 9.99999974E-6 : f32
      %27 = vector.broadcast %cst_15 : f32 to vector<64x1xf32>
      %28 = arith.addf %26, %27 : vector<64x1xf32>
      %29 = math.rsqrt %28 : vector<64x1xf32>
      %30 = vector.broadcast %29 : vector<64x1xf32> to vector<64x64xf32>
      %31 = arith.mulf %21, %30 : vector<64x64xf32>
      %c0_16 = arith.constant 0 : index
      %c0_17 = arith.constant 0 : index
      %32 = vector.load %arg5[%c0_16, %c0_17] : memref<64x1xf32, #tpu.memory_space<vmem>>, vector<64x1xf32>
      %33 = vector.broadcast %32 : vector<64x1xf32> to vector<64x64xf32>
      %34 = arith.mulf %31, %33 : vector<64x64xf32>
      %c0_18 = arith.constant 0 : index
      %c0_19 = arith.constant 0 : index
      %35 = vector.load %arg6[%c0_18, %c0_19] : memref<64x1xf32, #tpu.memory_space<vmem>>, vector<64x1xf32>
      %36 = vector.broadcast %35 : vector<64x1xf32> to vector<64x64xf32>
      %37 = arith.addf %34, %36 : vector<64x64xf32>
      %c0_20 = arith.constant 0 : index
      %c0_21 = arith.constant 0 : index
      %38 = vector.load %arg7[%c0_20, %c0_21] : memref<64x64xf32, #tpu.memory_space<vmem>>, vector<64x64xf32>
      tpu.vector_store %arg7[%c0_20, %c0_21], %37 {strides = array<i32>} : memref<64x64xf32, #tpu.memory_space<vmem>>, vector<64x64xf32>,
    } else {
    }
    return
  }
  func.func @transform_0(%arg0: i32, %arg1: i32) -> (i32, i32) {
    %c0_i32 = arith.constant 0 : i32
    %c0_i32_0 = arith.constant 0 : i32
    return %arg1, %c0_i32 : i32, i32
  }
  func.func @transform_1(%arg0: i32, %arg1: i32) -> (i32, i32) {
    %c0_i32 = arith.constant 0 : i32
    %c0_i32_0 = arith.constant 0 : i32
    return %arg1, %c0_i32 : i32, i32
  }
  func.func @transform_2(%arg0: i32, %arg1: i32) -> (i32, i32) {
    %c0_i32 = arith.constant 0 : i32
    return %arg0, %arg1 : i32, i32
  }
  func.func @transform_3(%arg0: i32, %arg1: i32) -> (i32, i32) {
    %c0_i32 = arith.constant 0 : i32
    %c0_i32_0 = arith.constant 0 : i32
    return %arg0, %c0_i32 : i32, i32
  }
  func.func @transform_4(%arg0: i32, %arg1: i32) -> (i32, i32) {
    %c0_i32 = arith.constant 0 : i32
    %c0_i32_0 = arith.constant 0 : i32
    return %arg0, %c0_i32 : i32, i32
  }
  func.func @transform_5(%arg0: i32, %arg1: i32) -> (i32, i32) {
    %c0_i32 = arith.constant 0 : i32
    %c0_i32_0 = arith.constant 0 : i32
    return %arg0, %c0_i32 : i32, i32
  }
}

</mosaic_0001>

<bundles_post_ra>
// kernel: tpu_custom_call.1
= control target key start
LH: loop header
LB: loop body
LE: loop exit
PB: predicated region body
PF: predicated region fallthrough
CT: control target
= control target key end

     0   :  { %s1455_s18 = smov 0   ;;  %s1457_s19 = smov 0   ;;  %s1799_s0 = inlined_call_operand.vmem [shape: bf16[256,1], index: 0, kind: input, shape index: {}]   ;;  %s1800_s1 = inlined_call_operand.vmem [shape: bf16[256,64], index: 1, kind: input, shape index: {}]   ;;  %s1801_s2 = inlined_call_operand.vmem [shape: bf16[256,256], index: 2, kind: input, shape index: {}]   ;;  %s1802_s3 = inlined_call_operand.vmem [shape: f32[256,1], index: 3, kind: input, shape index: {}]   ;;  %s1803_s4 = inlined_call_operand.vmem [shape: f32[256,1], index: 4, kind: input, shape index: {}]   ;;  %s1804_s5 = inlined_call_operand.vmem [shape: f32[256,64], index: 5, kind: output, shape index: {}]  }
   0x1   :  { %s1459_s20 = smov 0   ;;  %s1461_s21 = smov 0  }
   0x2   :  { %s1463_s22 = smov 0   ;;  %s1465_s23 = smov 0  }
   0x3   :  { %s1467_s24 = smov 0  }
   0x4 LB: > { %s24_s25 = sadd.s32 1, %s1412_s22  ;;  %s27_s26 = sadd.s32 1, %s1416_s23  ;;  %s1420_s24 = sphi %s1467_s24, %s15_s24   ;;  %s1416_s23 = sphi %s1465_s23, %s1810_s23   ;;  %s1412_s22 = sphi %s1463_s22, %s1809_s22   ;;  %s1408_s21 = sphi %s1461_s21, %s1808_s21   ;;  %s1404_s20 = sphi %s1459_s20, %s1807_s20   ;;  %s1400_s19 = sphi %s1457_s19, %s1806_s19   ;;  %s1396_s18 = sphi %s1455_s18, %s1805_s18  }
   0x5   : > { %p25_p0 = scmp.ge.s32.totalorder %s24_s25, 2  ;;  %p95_p1 = scmp.ne.s32.totalorder %s1400_s19, %s1396_s18 }
   0x6   : > { %p96_p2 = scmp.eq.s32.totalorder %s1420_s24, 0  ;;  %s88_s30 = sadd.s32 1, %s1400_s19 }
   0x7   : > { %s1812_s25 = smov (%p25_p0, %s24_s25), 0  ;;  %s1814_s26 = smov (!%p25_p0, %s27_s26), %s1416_s23 }
   0x8   : > { %p97_p3 = por %p96_p2, %p95_p1  ;;  %p29_p4 = scmp.ge.s32.totalorder %s1814_s26, 4 }
   0x9   : > { %s84_s27 = ssub.s32 %s1412_s22, %s1812_s25  ;;  %p1196_p6 = scmp.ge.s32.totalorder %s1420_s24, 8 }
   0xa   : > { %s1816_s26 = smov (%p29_p4, %s1814_s26), 0 }
   0xb   : > { %s83_s28 = ssub.s32 %s1416_s23, %s1816_s26  ;;  %199 = sbr.rel (%p1196_p6) target bundleno = 27 (0x1b), region = 16 }
   0xc   : > { %s85_s29 = sor.u32 %s84_s27, %s83_s28 }
   0xd   : > { %p86_p5 = scmp.eq.s32.totalorder %s85_s29, 0 }
   0xf   : > { %s1506_s6 = scalar_select %p86_p5, %s1400_s19, %s88_s30  }
  0x10   : > { %220 = sbr.rel (!%p97_p3) target bundleno = 27 (0x1b), region = 28  ;;  %s222_s7 = sand.u32 (%p97_p3), 1, %s1400_s19  }
  0x11   : > { %s1230_s8 = sshll.u32 (%p97_p3), %s1416_s23, 4  ;;  %s1197_s9 = sshll.u32 (%p97_p3), %s222_s7, 5 }
  0x12   : > { %s227_s10 = sadd.s32 (%p97_p3), %s1412_s22, %s1230_s8  ;;  %s224_s15 = scalar_lea.vmem (%p97_p3), [#allocation2], %s1197_s9 }
  0x13   : > { %s1200_s11 = sshll.u32 (%p97_p3), %s227_s10, 2 }
  0x14   : > { %s229_s14 = scalar_lea.vmem (%p97_p3), %s1801_s2, %s1200_s11 }
  0x15   : > { %v246_v0 = vld [vmem:[%s229_s14] sm:$0xf]  ;;  %v248_v1 = vld [vmem:[%s229_s14 + $0x8] sm:$0xf]  ;;  %v250_v2 = vld [vmem:[%s229_s14 + $0x10] sm:$0xf] }
  0x16   : > { %247 = vst [vmem:[%s224_s15] sm:$0xf] %v246_v0  ;;  %249 = vst [vmem:[%s224_s15 + $0x4] sm:$0xf] %v248_v1  ;;  %v252_v3 = vld [vmem:[%s229_s14 + $0x18] sm:$0xf] }
  0x17   : > { %251 = vst [vmem:[%s224_s15 + $0x8] sm:$0xf] %v250_v2  ;;  %v254_v4 = vld [vmem:[%s229_s14 + $0x20] sm:$0xf]  ;;  %v256_v5 = vld [vmem:[%s229_s14 + $0x28] sm:$0xf] }
  0x18   : > { %253 = vst [vmem:[%s224_s15 + $0xc] sm:$0xf] %v252_v3  ;;  %255 = vst [vmem:[%s224_s15 + $0x10] sm:$0xf] %v254_v4  ;;  %v258_v6 = vld [vmem:[%s229_s14 + $0x30] sm:$0xf] }
  0x19   : > { %257 = vst [vmem:[%s224_s15 + $0x14] sm:$0xf] %v256_v5  ;;  %v260_v7 = vld [vmem:[%s229_s14 + $0x38] sm:$0xf]  ;;  %259 = vst [vmem:[%s224_s15 + $0x18] sm:$0xf] %v258_v6 }
  0x1a   : > { %261 = vst [vmem:[%s224_s15 + $0x1c] sm:$0xf] %v260_v7 }
  0x1b PF: > { %p1201_p7 = scmp.ge.s32.totalorder %s1420_s24, 1  ;;  %p318_p8 = scmp.lt.s32.totalorder %s1420_s24, 9 }
  0x1d   : > { %p319_p9 = pnand %p1201_p7, %p318_p8 }
  0x1e   : > { %s1203_s16 = sshll.u32 (!%p319_p9), %s1404_s20, 4  ;;  %s1207_s30 = sshll.u32 (!%p319_p9), %s1408_s21, 3 }
  0x1f   : > { %322 = sbr.rel (%p319_p9) target bundleno = 757 (0x2f5), region = 77  ;;  %p373_p10 = scmp.lt.s32.totalorder (!%p319_p9), %s1203_s16, 31 }
  0x20   : > { %p386_p11 = scmp.lt.s32.totalorder (!%p319_p9), %s1207_s30, 31  ;;  %s325_s27 = sand.u32 (!%p319_p9), 1, %s1396_s18  }
  0x21   : > { %s1202_s28 = sshll.u32 (!%p319_p9), %s325_s27, 5  ;;  %p1225_p12 = scmp.ne.s32.totalorder (!%p319_p9), %s1404_s20, 0 }
  0x24   : > { %v1422_v8 = vmov 0   ;;  %s1818_s16 = smov (!%p373_p10, %s1203_s16), 31  ;;  %s1820_s30 = smov (!%p386_p11, %s1207_s30), 31  ;;  %v1423_v27 = vmov 839922192   ;;  %v444_v29 = vlaneseq }
  0x25   : > { %1343 = vset.pattern.permute.xlu1 %v1422_v8  ;;  %1342 = vset.pattern.permute.xlu0 %v1422_v8  ;;  %s1204_s17 = sshll.u32 %s1818_s16, 2  ;;  %s1208_s7 = sshll.u32 %s1820_s30, 3  ;;  %v442_v28 = vunpack.c.l.s4 %v1423_v27 }
  0x26   : > { %s1526_s29 = scalar_lea.vmem %s1799_s0, %s1204_s17  ;;  %s1542_s10 = scalar_lea.vmem %s1802_s3, %s1208_s7  ;;  %v445_v31 = vshrl.u32 %v444_v29, 7 }
  0x27   : > { %v418_v9 = vld [vmem:[%s1526_s29 + $0x38] sm:$0xf]  ;;  %v416_v10 = vld [vmem:[%s1526_s29 + $0x30] sm:$0xf]  ;;  %v419_v11 = vld [vmem:[%s1526_s29 + $0x3c] sm:$0xf]  ;;  %s1547_s12 = scalar_lea.vmem %s1803_s4, %s1208_s7  ;;  %s1552_s15 = scalar_lea.vmem %s1804_s5, %s1208_s7  ;;  %v443_v30 = vunpack.c.0.s8 %v442_v28 }
  0x28   : > { %606 = vperm.xlu0 %1342, %v418_v9   ;;  %582 = vperm.xlu1 %1343, %v416_v10   ;;  %v417_v12 = vld [vmem:[%s1526_s29 + $0x34] sm:$0xf]  ;;  %v415_v13 = vld [vmem:[%s1526_s29 + $0x2c] sm:$0xf]  ;;  %v414_v14 = vld [vmem:[%s1526_s29 + $0x28] sm:$0xf]  ;;  %s1572_s18 = scalar_lea.vmem %s1800_s1, %s1204_s17 }
  0x29   : > { %v413_v15 = vld [vmem:[%s1526_s29 + $0x24] sm:$0xf]  ;;  %v412_v16 = vld [vmem:[%s1526_s29 + $0x20] sm:$0xf]  ;;  %v411_v17 = vld [vmem:[%s1526_s29 + $0x1c] sm:$0xf]  ;;  %v1565_v32 = vsub.s32 %v443_v30, %v445_v31 }
  0x2a   : > { %v410_v18 = vld [vmem:[%s1526_s29 + $0x18] sm:$0xf]  ;;  %v409_v19 = vld [vmem:[%s1526_s29 + $0x14] sm:$0xf]  ;;  %v408_v20 = vld [vmem:[%s1526_s29 + $0x10] sm:$0xf] }
  0x2b   : > { %v407_v21 = vld [vmem:[%s1526_s29 + $0xc] sm:$0xf]  ;;  %v406_v22 = vld [vmem:[%s1526_s29 + $0x8] sm:$0xf]  ;;  %v405_v23 = vld [vmem:[%s1526_s29 + $0x4] sm:$0xf] }
  0x2c   : > { %618 = vperm.xlu0 %1342, %v419_v11   ;;  %594 = vperm.xlu1 %1343, %v417_v12   ;;  %v404_v24 = vld [vmem:[%s1526_s29] sm:$0xf]  ;;  %s1561_s30 = scalar_lea.vmem [#allocation2], %s1202_s28  ;;  %v434_v35 = vld [vmem:[%s1572_s18 + $0x38] sm:$0xf] }
  0x2d   : > { %v1344_v25 = vld [vmem:[%s1561_s30] sm:$0xff]   ;;  %v1345_v26 = vld [vmem:[%s1561_s30 + $0x10] sm:$0xff]   ;;  %v435_v39 = vld [vmem:[%s1572_s18 + $0x3c] sm:$0xf] }
  0x2e   : > { %1259 = vmatprep.mubr.bf16.mxu0 %v1344_v25  ;;  %1263 = vmatprep.mubr.bf16.mxu1 %v1345_v26  ;;  %v432_v38 = vld [vmem:[%s1572_s18 + $0x30] sm:$0xf]  ;;  %v433_v41 = vld [vmem:[%s1572_s18 + $0x34] sm:$0xf]  ;;  %v431_v49 = vld [vmem:[%s1572_s18 + $0x2c] sm:$0xf] }
  0x2f   : > { %v430_v51 = vld [vmem:[%s1572_s18 + $0x28] sm:$0xf]  ;;  %v429_v59 = vld [vmem:[%s1572_s18 + $0x24] sm:$0xf]  ;;  %v428_v61 = vld [vmem:[%s1572_s18 + $0x20] sm:$0xf] }
  0x30   : > { %570 = vperm.xlu1 %1343, %v415_v13   ;;  %558 = vperm.xlu0 %1342, %v414_v14   ;;  %v427_v4 = vld [vmem:[%s1572_s18 + $0x1c] sm:$0xf]  ;;  %v426_v6 = vld [vmem:[%s1572_s18 + $0x18] sm:$0xf]  ;;  %v425_v13 = vld [vmem:[%s1572_s18 + $0x14] sm:$0xf] }
  0x31   : > { %v421_v31 = vld [vmem:[%s1572_s18 + $0x4] sm:$0xf] }
  0x34   : > { %546 = vperm.xlu1 %1343, %v413_v15   ;;  %534 = vperm.xlu0 %1342, %v412_v16   ;;  %v424_v15 = vld [vmem:[%s1572_s18 + $0x10] sm:$0xf] }
  0x38   : > { %522 = vperm.xlu1 %1343, %v411_v17   ;;  %510 = vperm.xlu0 %1342, %v410_v18  }
  0x3c   : > { %498 = vperm.xlu1 %1343, %v409_v19   ;;  %486 = vperm.xlu0 %1342, %v408_v20  }
  0x40   : > { %474 = vperm.xlu1 %1343, %v407_v21   ;;  %462 = vperm.xlu0 %1342, %v406_v22   ;;  %v423_v22 = vld [vmem:[%s1572_s18 + $0xc] sm:$0xf] }
  0x44   : > { %450 = vperm.xlu1 %1343, %v405_v23   ;;  %438 = vperm.xlu0 %1342, %v404_v24   ;;  %v422_v24 = vld [vmem:[%s1572_s18 + $0x8] sm:$0xf] }
  0xa3   : > { %v607_v33 = vpop.permute.xlu0 %606  ;;  %v583_v34 = vpop.permute.xlu1 %582 }
  0xa4   : > { %v615_v36 = vrot.slane %v607_v33, %v1565_v32  ;;  %v591_v37 = vrot.slane %v583_v34, %v1565_v32  ;;  %v420_v34 = vld [vmem:[%s1572_s18] sm:$0xf] }
  0xa6   : > { %v642_v45 = vmul.bf16 %v615_v36, %v434_v35  ;;  %v640_v46 = vmul.bf16 %v591_v37, %v432_v38 }
  0xa7   : > { %v619_v40 = vpop.permute.xlu0 %618  ;;  %v595_v42 = vpop.permute.xlu1 %594 }
  0xa8   : > { %v627_v43 = vrot.slane %v619_v40, %v1565_v32  ;;  %v603_v44 = vrot.slane %v595_v42, %v1565_v32  ;;  %v1346_v42 = vld [vmem:[%s1561_s30 + $0x8] sm:$0xff]  }
  0xaa   : > { %v643_v47 = vmul.bf16 %v627_v43, %v435_v39  ;;  %v641_v48 = vmul.bf16 %v603_v44, %v433_v41  ;;  %v1347_v43 = vld [vmem:[%s1561_s30 + $0x18] sm:$0xff]  }
  0xab   : > { %v571_v50 = vpop.permute.xlu1 %570  ;;  %v559_v52 = vpop.permute.xlu0 %558 }
  0xac   : > { %v1224_v53 = vcombine.low %v642_v45, %v643_v47  ;;  %v579_v54 = vrot.slane %v571_v50, %v1565_v32  ;;  %v567_v55 = vrot.slane %v559_v52, %v1565_v32  ;;  %v1223_v56 = vcombine.low %v640_v46, %v641_v48 }
  0xae   : > { %v639_v57 = vmul.bf16 %v579_v54, %v431_v49  ;;  %v638_v58 = vmul.bf16 %v567_v55, %v430_v51  ;;  %1243 = vmatprep.subr.bf16.mxu0 %v1224_v53  ;;  %1267 = vmatprep.subr.bf16.mxu1 %v1224_v53 }
  0xaf   : > { %1244 = vmatpush3.bf16.msra.mxu0 %v1224_v53  ;;  %1275 = vmatpush3.bf16.msra.mxu1 %v1224_v53  ;;  %v547_v60 = vpop.permute.xlu1 %546  ;;  %v535_v62 = vpop.permute.xlu0 %534 }
  0xb0   : > { %v555_v63 = vrot.slane %v547_v60, %v1565_v32  ;;  %v543_v0 = vrot.slane %v535_v62, %v1565_v32  ;;  %1245 = vmatprep.subr.bf16.mxu0 %v1223_v56  ;;  %1268 = vmatprep.subr.bf16.mxu1 %v1223_v56  ;;  %v1222_v1 = vcombine.low %v638_v58, %v639_v57 }
  0xb2   : > { %v637_v2 = vmul.bf16 %v555_v63, %v429_v59  ;;  %v636_v3 = vmul.bf16 %v543_v0, %v428_v61 }
  0xb3   : > { %1246 = vmatpush3.bf16.msra.mxu0 %v1223_v56  ;;  %1276 = vmatpush3.bf16.msra.mxu1 %v1223_v56  ;;  %v523_v5 = vpop.permute.xlu1 %522  ;;  %v511_v7 = vpop.permute.xlu0 %510 }
  0xb4   : > { %v531_v8 = vrot.slane %v523_v5, %v1565_v32  ;;  %v519_v9 = vrot.slane %v511_v7, %v1565_v32  ;;  %1247 = vmatprep.subr.bf16.mxu0 %v1222_v1  ;;  %1269 = vmatprep.subr.bf16.mxu1 %v1222_v1  ;;  %v1221_v10 = vcombine.low %v636_v3, %v637_v2 }
  0xb6   : > { %v635_v11 = vmul.bf16 %v531_v8, %v427_v4  ;;  %v634_v12 = vmul.bf16 %v519_v9, %v426_v6 }
  0xb7   : > { %1248 = vmatpush3.bf16.msra.mxu0 %v1222_v1  ;;  %1277 = vmatpush3.bf16.msra.mxu1 %v1222_v1  ;;  %v499_v14 = vpop.permute.xlu1 %498  ;;  %v487_v16 = vpop.permute.xlu0 %486 }
  0xb8   : > { %v507_v17 = vrot.slane %v499_v14, %v1565_v32  ;;  %v495_v18 = vrot.slane %v487_v16, %v1565_v32  ;;  %1249 = vmatprep.subr.bf16.mxu0 %v1221_v10  ;;  %1270 = vmatprep.subr.bf16.mxu1 %v1221_v10  ;;  %v1220_v19 = vcombine.low %v634_v12, %v635_v11 }
  0xba   : > { %v633_v20 = vmul.bf16 %v507_v17, %v425_v13  ;;  %v632_v21 = vmul.bf16 %v495_v18, %v424_v15 }
  0xbb   : > { %1250 = vmatpush3.bf16.msra.mxu0 %v1221_v10  ;;  %1278 = vmatpush3.bf16.msra.mxu1 %v1221_v10  ;;  %v475_v23 = vpop.permute.xlu1 %474  ;;  %v463_v25 = vpop.permute.xlu0 %462 }
  0xbc   : > { %v483_v26 = vrot.slane %v475_v23, %v1565_v32  ;;  %v471_v27 = vrot.slane %v463_v25, %v1565_v32  ;;  %1251 = vmatprep.subr.bf16.mxu0 %v1220_v19  ;;  %1271 = vmatprep.subr.bf16.mxu1 %v1220_v19  ;;  %v1219_v28 = vcombine.low %v632_v21, %v633_v20 }
  0xbe   : > { %v631_v29 = vmul.bf16 %v483_v26, %v423_v22  ;;  %v630_v30 = vmul.bf16 %v471_v27, %v422_v24 }
  0xbf   : > { %1252 = vmatpush3.bf16.msra.mxu0 %v1220_v19  ;;  %1279 = vmatpush3.bf16.msra.mxu1 %v1220_v19  ;;  %v451_v33 = vpop.permute.xlu1 %450  ;;  %v439_v35 = vpop.permute.xlu0 %438 }
  0xc0   : > { %v459_v36 = vrot.slane %v451_v33, %v1565_v32  ;;  %v447_v37 = vrot.slane %v439_v35, %v1565_v32  ;;  %1253 = vmatprep.subr.bf16.mxu0 %v1219_v28  ;;  %1272 = vmatprep.subr.bf16.mxu1 %v1219_v28  ;;  %v1218_v38 = vcombine.low %v630_v30, %v631_v29 }
  0xc2   : > { %v629_v39 = vmul.bf16 %v459_v36, %v421_v31  ;;  %v628_v40 = vmul.bf16 %v447_v37, %v420_v34 }
  0xc3   : > { %1254 = vmatpush3.bf16.msra.mxu0 %v1219_v28  ;;  %1280 = vmatpush3.bf16.msra.mxu1 %v1219_v28 }
  0xc4   : > { %1255 = vmatprep.subr.bf16.mxu0 %v1218_v38  ;;  %1273 = vmatprep.subr.bf16.mxu1 %v1218_v38  ;;  %v1217_v41 = vcombine.low %v628_v40, %v629_v39 }
  0xc7   : > { %1256 = vmatpush3.bf16.msra.mxu0 %v1218_v38  ;;  %1281 = vmatpush3.bf16.msra.mxu1 %v1218_v38 }
  0xc8   : > { %1257 = vmatprep.subr.bf16.mxu0 %v1217_v41  ;;  %1274 = vmatprep.subr.bf16.mxu1 %v1217_v41 }
  0xcb   : > { %1258 = vmatpush3.bf16.msra.mxu0 %v1217_v41  ;;  %1282 = vmatpush3.bf16.msra.mxu1 %v1217_v41 }
  0xce   : > { %1260 = vmatmul.mubr.bf16.vlgmr.msra.gmra.mxu0 %v1346_v42  ;;  %1264 = vmatmul.mubr.bf16.vlgmr.msra.gmra.mxu1 %v1347_v43 }
 0x18e   : > { %v1261_v32 = vpop.f32.mrf.mxu0  ;;  %v1265_v44 = vpop.f32.mrf.mxu1 }
 0x190   : > { %v758_v45 = vpop.f32.mrf.mxu0  ;;  %v774_v46 = vpop.f32.mrf.mxu1  ;;  %792 = sbr.rel (%p1225_p12) target bundleno = 410 (0x19a), region = 85 }
 0x192   : > { %v1262_v47 = vpop.f32.mrf.mxu0  ;;  %v1266_v48 = vpop.f32.mrf.mxu1 }
 0x194   : > { %v761_v49 = vpop.f32.mrf.mxu0  ;;  %v777_v50 = vpop.f32.mrf.mxu1 }
 0x195   : > { %vm793_vm0 = vcmask 523264  }
 0x196   : > { %794 = vst.msk [vmem:[%s1552_s15] sm:$0xff] %vm793_vm0, %v758_v45  ;;  %795 = vst.msk [vmem:[%s1552_s15 + $0x8] sm:$0xff] %vm793_vm0, %v761_v49 }
 0x197   : > { %796 = vst.msk [vmem:[%s1552_s15 + $0x10] sm:$0xff] %vm793_vm0, %v1261_v32  ;;  %797 = vst.msk [vmem:[%s1552_s15 + $0x18] sm:$0xff] %vm793_vm0, %v1262_v47 }
 0x198   : > { %798 = vst.msk [vmem:[%s1552_s15 + $0x20] sm:$0xff] %vm793_vm0, %v774_v46  ;;  %799 = vst.msk [vmem:[%s1552_s15 + $0x28] sm:$0xff] %vm793_vm0, %v777_v50 }
 0x199   : > { %800 = vst.msk [vmem:[%s1552_s15 + $0x30] sm:$0xff] %vm793_vm0, %v1265_v44  ;;  %801 = vst.msk [vmem:[%s1552_s15 + $0x38] sm:$0xff] %vm793_vm0, %v1266_v48 }
 0x19a PF: > { %p1226_p13 = scmp.eq.s32.totalorder %s1404_s20, 0 }
 0x19c   : > { %805 = sbr.rel (%p1226_p13) target bundleno = 424 (0x1a8), region = 89 }
 0x1a1   : > { %v806_v51 = vld [vmem:[%s1552_s15] sm:$0xff]  ;;  %vm822_vm1 = vcmask 523264   ;;  %v807_v52 = vld [vmem:[%s1552_s15 + $0x8] sm:$0xff]  ;;  %v808_v53 = vld [vmem:[%s1552_s15 + $0x10] sm:$0xff] }
 0x1a2   : > { %v814_v54 = vadd.f32 %v806_v51, %v758_v45  ;;  %v815_v55 = vadd.f32 %v807_v52, %v761_v49  ;;  %v816_v56 = vadd.f32 %v1261_v32, %v808_v53  ;;  %v809_v57 = vld [vmem:[%s1552_s15 + $0x18] sm:$0xff]  ;;  %v810_v58 = vld [vmem:[%s1552_s15 + $0x20] sm:$0xff]  ;;  %v811_v59 = vld [vmem:[%s1552_s15 + $0x28] sm:$0xff] }
 0x1a3   : > { %v817_v60 = vadd.f32 %v1262_v47, %v809_v57  ;;  %v818_v61 = vadd.f32 %v810_v58, %v774_v46  ;;  %v819_v62 = vadd.f32 %v811_v59, %v777_v50  ;;  %v812_v63 = vld [vmem:[%s1552_s15 + $0x30] sm:$0xff]  ;;  %v813_v0 = vld [vmem:[%s1552_s15 + $0x38] sm:$0xff] }
 0x1a4   : > { %823 = vst.msk [vmem:[%s1552_s15] sm:$0xff] %vm822_vm1, %v814_v54  ;;  %824 = vst.msk [vmem:[%s1552_s15 + $0x8] sm:$0xff] %vm822_vm1, %v815_v55  ;;  %v820_v1 = vadd.f32 %v1265_v44, %v812_v63  ;;  %v821_v2 = vadd.f32 %v1266_v48, %v813_v0 }
 0x1a5   : > { %825 = vst.msk [vmem:[%s1552_s15 + $0x10] sm:$0xff] %vm822_vm1, %v816_v56  ;;  %826 = vst.msk [vmem:[%s1552_s15 + $0x18] sm:$0xff] %vm822_vm1, %v817_v60 }
 0x1a6   : > { %827 = vst.msk [vmem:[%s1552_s15 + $0x20] sm:$0xff] %vm822_vm1, %v818_v61  ;;  %828 = vst.msk [vmem:[%s1552_s15 + $0x28] sm:$0xff] %vm822_vm1, %v819_v62 }
 0x1a7   : > { %829 = vst.msk [vmem:[%s1552_s15 + $0x30] sm:$0xff] %vm822_vm1, %v820_v1  ;;  %830 = vst.msk [vmem:[%s1552_s15 + $0x38] sm:$0xff] %vm822_vm1, %v821_v2 }
 0x1a8 PF: > { %p1227_p0 = scmp.ne.s32.totalorder %s1404_s20, 1 }
 0x1aa   : > { %834 = sbr.rel (%p1227_p0) target bundleno = 757 (0x2f5), region = 93 }
 0x1af   : > { %v835_v3 = vld [vmem:[%s1552_s15] sm:$0xff]  ;;  %vm843_vm2 = vcmask 523264   ;;  %v837_v4 = vld [vmem:[%s1552_s15 + $0x10] sm:$0xff]  ;;  %v1646_v5 = vld [vmem:[%s1552_s15 + $0x8] sm:$0xff]  ;;  %v1424_v9 = vmov 0  }
 0x1b0   : > { %v844_v6 = vsel %vm843_vm2, %v835_v3, 0.0  ;;  %v850_v7 = vsel %vm843_vm2, %v837_v4, 0.0  ;;  %v1651_v8 = vld [vmem:[%s1552_s15 + $0x18] sm:$0xff]  ;;  %1349 = vset.pattern.permute.xlu1 %v1424_v9  ;;  %1348 = vset.pattern.permute.xlu0 %v1424_v9  ;;  %v847_v10 = vsel %vm843_vm2, %v1646_v5, 0.0  ;;  %v1658_v12 = vld [vmem:[%s1552_s15 + $0x20] sm:$0xff]  ;;  %v1661_v13 = vld [vmem:[%s1552_s15 + $0x28] sm:$0xff] }
 0x1b1   : > { %845 = vadd.xlane.f32.xlu0 %v844_v6  ;;  %851 = vadd.xlane.f32.xlu1 %v850_v7  ;;  %v853_v11 = vsel %vm843_vm2, %v1651_v8, 0.0  ;;  %v856_v14 = vsel %vm843_vm2, %v1658_v12, 0.0  ;;  %v859_v15 = vsel %vm843_vm2, %v1661_v13, 0.0  ;;  %v1668_v16 = vld [vmem:[%s1552_s15 + $0x30] sm:$0xff]  ;;  %v1671_v17 = vld [vmem:[%s1552_s15 + $0x38] sm:$0xff]  ;;  %v950_v20 = vld [vmem:[%s1542_s10 + $0x8] sm:$0xff] }
 0x1b2   : > { %v862_v18 = vsel %vm843_vm2, %v1668_v16, 0.0  ;;  %v865_v19 = vsel %vm843_vm2, %v1671_v17, 0.0  ;;  %v951_v21 = vld [vmem:[%s1542_s10 + $0x10] sm:$0xff]  ;;  %v949_v22 = vld [vmem:[%s1542_s10] sm:$0xff]  ;;  %v952_v23 = vld [vmem:[%s1542_s10 + $0x18] sm:$0xff] }
 0x1b3   : > { %v1006_v24 = vld [vmem:[%s1547_s12 + $0x8] sm:$0xff]  ;;  %v953_v25 = vld [vmem:[%s1542_s10 + $0x20] sm:$0xff]  ;;  %v1008_v26 = vld [vmem:[%s1547_s12 + $0x18] sm:$0xff] }
 0x1b4   : > { %v954_v27 = vld [vmem:[%s1542_s10 + $0x28] sm:$0xff]  ;;  %v955_v29 = vld [vmem:[%s1542_s10 + $0x30] sm:$0xff]  ;;  %v956_v30 = vld [vmem:[%s1542_s10 + $0x38] sm:$0xff] }
 0x1b5   : > { %848 = vadd.xlane.f32.xlu0 %v847_v10  ;;  %854 = vadd.xlane.f32.xlu1 %v853_v11  ;;  %v1010_v28 = vld [vmem:[%s1547_s12 + $0x28] sm:$0xff]  ;;  %v1005_v31 = vld [vmem:[%s1547_s12] sm:$0xff]  ;;  %v1007_v33 = vld [vmem:[%s1547_s12 + $0x10] sm:$0xff] }
 0x1b6   : > { %v1009_v34 = vld [vmem:[%s1547_s12 + $0x20] sm:$0xff]  ;;  %v1011_v10 = vld [vmem:[%s1547_s12 + $0x30] sm:$0xff]  ;;  %v1012_v11 = vld [vmem:[%s1547_s12 + $0x38] sm:$0xff] }
 0x1b9   : > { %857 = vadd.xlane.f32.xlu0 %v856_v14  ;;  %860 = vadd.xlane.f32.xlu1 %v859_v15 }
 0x1bd   : > { %863 = vadd.xlane.f32.xlu0 %v862_v18  ;;  %866 = vadd.xlane.f32.xlu1 %v865_v19 }
 0x1ce   : > { %964 = vperm.xlu1 %1349, %v950_v20  }
 0x1d2   : > { %969 = vperm.xlu1 %1349, %v951_v21  }
 0x1d3   : > { %959 = vperm.xlu0 %1348, %v949_v22  }
 0x1d6   : > { %974 = vperm.xlu1 %1349, %v952_v23  }
 0x1d7   : > { %1020 = vperm.xlu0 %1348, %v1006_v24  }
 0x1da   : > { %979 = vperm.xlu1 %1349, %v953_v25  }
 0x1db   : > { %1030 = vperm.xlu0 %1348, %v1008_v26  }
 0x1de   : > { %984 = vperm.xlu1 %1349, %v954_v27  }
 0x1df   : > { %1040 = vperm.xlu0 %1348, %v1010_v28  }
 0x1e2   : > { %989 = vperm.xlu1 %1349, %v955_v29  }
 0x1e6   : > { %994 = vperm.xlu1 %1349, %v956_v30  }
 0x1ea   : > { %1015 = vperm.xlu1 %1349, %v1005_v31  }
 0x1ee   : > { %1025 = vperm.xlu1 %1349, %v1007_v33  }
 0x1f2   : > { %1035 = vperm.xlu1 %1349, %v1009_v34  }
 0x23a   : > { %v846_v35 = vpop.xlane.xlu0 %845  ;;  %v852_v36 = vpop.xlane.xlu1 %851 }
 0x23b   : > { %v869_v37 = vmul.f32 0.015625, %v846_v35  ;;  %v871_v38 = vmul.f32 0.015625, %v852_v36 }
 0x23d   : > { %v1691_v39 = vsub.f32 %v835_v3, %v869_v37  ;;  %v1693_v40 = vsub.f32 %v837_v4, %v871_v38 }
 0x23e   : > { %v849_v41 = vpop.xlane.xlu0 %848  ;;  %v855_v42 = vpop.xlane.xlu1 %854 }
 0x23f   : > { %v870_v43 = vmul.f32 0.015625, %v849_v41  ;;  %v872_v32 = vmul.f32 0.015625, %v855_v42  ;;  %v885_v44 = vmul.f32 %v1691_v39, %v1691_v39  ;;  %v887_v45 = vmul.f32 %v1693_v40, %v1693_v40 }
 0x241   : > { %v1700_v46 = vsub.f32 %v1646_v5, %v870_v43  ;;  %v1703_v47 = vsub.f32 %v1651_v8, %v872_v32  ;;  %v893_v48 = vsel %vm843_vm2, %v885_v44, 0.0  ;;  %v899_v51 = vsel %vm843_vm2, %v887_v45, 0.0 }
 0x242   : > { %894 = vadd.xlane.f32.xlu0 %v893_v48  ;;  %v858_v49 = vpop.xlane.xlu0 %857  ;;  %v861_v50 = vpop.xlane.xlu1 %860 }
 0x243   : > { %v873_v52 = vmul.f32 0.015625, %v858_v49  ;;  %v874_v53 = vmul.f32 0.015625, %v861_v50  ;;  %v886_v54 = vmul.f32 %v1700_v46, %v1700_v46  ;;  %v888_v55 = vmul.f32 %v1703_v47, %v1703_v47 }
 0x245   : > { %v1712_v56 = vsub.f32 %v1658_v12, %v873_v52  ;;  %v1715_v57 = vsub.f32 %v1661_v13, %v874_v53  ;;  %v896_v58 = vsel %vm843_vm2, %v886_v54, 0.0  ;;  %v902_v61 = vsel %vm843_vm2, %v888_v55, 0.0 }
 0x246   : > { %900 = vadd.xlane.f32.xlu0 %v899_v51  ;;  %897 = vadd.xlane.f32.xlu1 %v896_v58  ;;  %v864_v59 = vpop.xlane.xlu0 %863  ;;  %v867_v60 = vpop.xlane.xlu1 %866 }
 0x247   : > { %v875_v62 = vmul.f32 0.015625, %v864_v59  ;;  %v876_v63 = vmul.f32 0.015625, %v867_v60  ;;  %v889_v0 = vmul.f32 %v1712_v56, %v1712_v56  ;;  %v890_v1 = vmul.f32 %v1715_v57, %v1715_v57 }
 0x249   : > { %v1724_v2 = vsub.f32 %v1668_v16, %v875_v62  ;;  %v1727_v3 = vsub.f32 %v1671_v17, %v876_v63  ;;  %v905_v4 = vsel %vm843_vm2, %v889_v0, 0.0  ;;  %v908_v5 = vsel %vm843_vm2, %v890_v1, 0.0 }
 0x24a   : > { %903 = vadd.xlane.f32.xlu1 %v902_v61  ;;  %906 = vadd.xlane.f32.xlu0 %v905_v4  ;;  %v965_v12 = vpop.permute.xlu1 %964 }
 0x24b   : > { %v891_v6 = vmul.f32 %v1724_v2, %v1724_v2  ;;  %v892_v7 = vmul.f32 %v1727_v3, %v1727_v3 }
 0x24d   : > { %v911_v8 = vsel %vm843_vm2, %v891_v6, 0.0  ;;  %v914_v9 = vsel %vm843_vm2, %v892_v7, 0.0 }
 0x24e   : > { %909 = vadd.xlane.f32.xlu1 %v908_v5  ;;  %912 = vadd.xlane.f32.xlu0 %v911_v8  ;;  %v970_v13 = vpop.permute.xlu1 %969  ;;  %v960_v18 = vpop.permute.xlu0 %959 }
 0x252   : > { %915 = vadd.xlane.f32.xlu1 %v914_v9  ;;  %v975_v14 = vpop.permute.xlu1 %974  ;;  %v1021_v20 = vpop.permute.xlu0 %1020 }
 0x256   : > { %v1739_v15 = vpop.permute.xlu1 %979  ;;  %v1031_v22 = vpop.permute.xlu0 %1030 }
 0x25a   : > { %v1741_v16 = vpop.permute.xlu1 %984  ;;  %v1747_v24 = vpop.permute.xlu0 %1040 }
 0x25e   : > { %v1743_v17 = vpop.permute.xlu1 %989 }
 0x262   : > { %v1745_v19 = vpop.permute.xlu1 %994 }
 0x263   : > { %1045 = vperm.xlu1 %1349, %v1011_v10  }
 0x264   : > { %1050 = vperm.xlu0 %1348, %v1012_v11  }
 0x266   : > { %v1016_v21 = vpop.permute.xlu1 %1015 }
 0x26a   : > { %v1026_v23 = vpop.permute.xlu1 %1025 }
 0x26e   : > { %v1036_v25 = vpop.permute.xlu1 %1035 }
 0x2cb   : > { %v895_v26 = vpop.xlane.xlu0 %894 }
 0x2cc   : > { %v917_v27 = vmul.f32 0.015625, %v895_v26 }
 0x2ce   : > { %v925_v28 = vadd.f32 1e-05, %v917_v27 }
 0x2cf   : > { %v898_v29 = vpop.xlane.xlu1 %897  ;;  %v901_v30 = vpop.xlane.xlu0 %900 }
 0x2d0   : > { %1350 = vrsqrt.f32 %v925_v28  ;;  %v918_v31 = vmul.f32 0.015625, %v898_v29  ;;  %v919_v33 = vmul.f32 0.015625, %v901_v30 }
 0x2d2   : > { %v926_v34 = vadd.f32 1e-05, %v918_v31  ;;  %v927_v35 = vadd.f32 1e-05, %v919_v33 }
 0x2d3   : > { %v904_v36 = vpop.xlane.xlu1 %903  ;;  %v907_v37 = vpop.xlane.xlu0 %906 }
 0x2d4   : > { %1352 = vrsqrt.f32 %v926_v34  ;;  %v920_v38 = vmul.f32 0.015625, %v904_v36  ;;  %v921_v41 = vmul.f32 0.015625, %v907_v37 }
 0x2d5   : > { %1354 = vrsqrt.f32 %v927_v35 }
 0x2d6   : > { %v928_v42 = vadd.f32 1e-05, %v920_v38  ;;  %v929_v43 = vadd.f32 1e-05, %v921_v41 }
 0x2d7   : > { %v910_v32 = vpop.xlane.xlu1 %909  ;;  %v913_v44 = vpop.xlane.xlu0 %912 }
 0x2d8   : > { %1356 = vrsqrt.f32 %v928_v42  ;;  %v922_v45 = vmul.f32 0.015625, %v910_v32  ;;  %v923_v48 = vmul.f32 0.015625, %v913_v44 }
 0x2d9   : > { %1358 = vrsqrt.f32 %v929_v43 }
 0x2da   : > { %v930_v49 = vadd.f32 1e-05, %v922_v45  ;;  %v931_v50 = vadd.f32 1e-05, %v923_v48 }
 0x2db   : > { %v916_v51 = vpop.xlane.xlu1 %915 }
 0x2dc   : > { %1360 = vrsqrt.f32 %v930_v49  ;;  %v924_v52 = vmul.f32 0.015625, %v916_v51 }
 0x2dd   : > { %v1351_v53 = vpop.eup %1350  ;;  %1362 = vrsqrt.f32 %v931_v50 }
 0x2de   : > { %v941_v54 = vmul.f32 %v1351_v53, %v1691_v39  ;;  %v932_v55 = vadd.f32 1e-05, %v924_v52 }
 0x2e0   : > { %v997_v58 = vmul.f32 %v960_v18, %v941_v54  ;;  %1364 = vrsqrt.f32 %v932_v55 }
 0x2e1   : > { %v1353_v59 = vpop.eup %1352 }
 0x2e2   : > { %v1355_v60 = vpop.eup %1354  ;;  %v1053_v61 = vadd.f32 %v1016_v21, %v997_v58  ;;  %v942_v62 = vmul.f32 %v1353_v59, %v1700_v46 }
 0x2e3   : > { %v943_v63 = vmul.f32 %v1355_v60, %v1693_v40 }
 0x2e4   : > { %1061 = vst.msk [vmem:[%s1552_s15] sm:$0xff] %vm843_vm2, %v1053_v61  ;;  %v998_v0 = vmul.f32 %v965_v12, %v942_v62 }
 0x2e5   : > { %v1357_v1 = vpop.eup %1356  ;;  %v999_v4 = vmul.f32 %v970_v13, %v943_v63 }
 0x2e6   : > { %v1359_v5 = vpop.eup %1358  ;;  %v1054_v39 = vadd.f32 %v1021_v20, %v998_v0  ;;  %v944_v6 = vmul.f32 %v1357_v1, %v1703_v47  ;;  %v1046_v20 = vpop.permute.xlu1 %1045 }
 0x2e7   : > { %v1055_v7 = vadd.f32 %v1026_v23, %v999_v4  ;;  %v945_v8 = vmul.f32 %v1359_v5, %v1712_v56 }
 0x2e8   : > { %1062 = vst.msk [vmem:[%s1552_s15 + $0x8] sm:$0xff] %vm843_vm2, %v1054_v39  ;;  %v1000_v9 = vmul.f32 %v975_v14, %v944_v6 }
 0x2e9   : > { %v1361_v46 = vpop.eup %1360  ;;  %1063 = vst.msk [vmem:[%s1552_s15 + $0x10] sm:$0xff] %vm843_vm2, %v1055_v7  ;;  %v1001_v40 = vmul.f32 %v1739_v15, %v945_v8 }
 0x2ea   : > { %v1363_v10 = vpop.eup %1362  ;;  %v1056_v11 = vadd.f32 %v1031_v22, %v1000_v9  ;;  %v946_v12 = vmul.f32 %v1361_v46, %v1715_v57 }
 0x2eb   : > { %v1057_v13 = vadd.f32 %v1036_v25, %v1001_v40  ;;  %v947_v47 = vmul.f32 %v1363_v10, %v1724_v2  ;;  %v1051_v2 = vpop.permute.xlu0 %1050 }
 0x2ec   : > { %1064 = vst.msk [vmem:[%s1552_s15 + $0x18] sm:$0xff] %vm843_vm2, %v1056_v11  ;;  %v1002_v56 = vmul.f32 %v1741_v16, %v946_v12 }
 0x2ed   : > { %v1365_v14 = vpop.eup %1364  ;;  %1065 = vst.msk [vmem:[%s1552_s15 + $0x20] sm:$0xff] %vm843_vm2, %v1057_v13  ;;  %v1003_v18 = vmul.f32 %v1743_v17, %v947_v47 }
 0x2ee   : > { %v1058_v15 = vadd.f32 %v1747_v24, %v1002_v56  ;;  %v948_v21 = vmul.f32 %v1365_v14, %v1727_v3 }
 0x2ef   : > { %v1059_v22 = vadd.f32 %v1046_v20, %v1003_v18 }
 0x2f0   : > { %1066 = vst.msk [vmem:[%s1552_s15 + $0x28] sm:$0xff] %vm843_vm2, %v1058_v15  ;;  %v1004_v57 = vmul.f32 %v1745_v19, %v948_v21 }
 0x2f1   : > { %1067 = vst.msk [vmem:[%s1552_s15 + $0x30] sm:$0xff] %vm843_vm2, %v1059_v22 }
 0x2f2   : > { %v1060_v23 = vadd.f32 %v1051_v2, %v1004_v57 }
 0x2f4   : > { %1068 = vst.msk [vmem:[%s1552_s15 + $0x38] sm:$0xff] %vm843_vm2, %v1060_v23 }
 0x2f5 PF: > { %s15_s24 = sadd.s32 1, %s1420_s24   ;;  %s1805_s18 = smov %s1400_s19 }
 0x2f6   : > { %p12_p1 = scmp.ge.s32.totalorder %s15_s24, 10   ;;  %s1806_s19 = smov %s1506_s6 }
 0x2f7   : > { %s1807_s20 = smov %s1412_s22  ;;  %s1808_s21 = smov %s1416_s23 }
 0x2f8   : > { %s1809_s22 = smov %s1812_s25  ;;  %s1810_s23 = smov %s1816_s26 }
 0x2f9   :  { %14 = sbr.rel (!%p12_p1) target bundleno = 4 (0x4), region = 140 }

</bundles_post_ra>
